<compile_context>
chip_gen: v7x
topology: tpu7x:2x2x1
jax: 0.10.0
libtpu: 0.0.40
codegen_flags: <defaults>
</compile_context>

<pallas_src>
import jax
import jax.numpy as jnp
from jax import lax
from jax.experimental import pallas as pl
from jax.experimental.pallas import tpu as pltpu


DROPOUT_P = 0.8
KEEP_PROB = 1.0 - DROPOUT_P                     # 0.2
INV_KEEP = 1.0 / KEEP_PROB                      # 5.0 (folded into W2 in prepare_params)
# Plain Python int so it is inlined as a literal at trace time.
KEEP_THRESHOLD = int(KEEP_PROB * (2.0 ** 32))   # uint32 bits < threshold => keep


def _uniform_u32(seed_u32, shape):
    """Counter-based uint32 hash (murmur3 finalizer).  Pure jnp/lax ops only, so it
    lowers on Mosaic TPU and the CPU interpreter alike, and can be replayed outside
    the kernel for reference checking."""
    rows = lax.broadcasted_iota(jnp.int32, shape, 0)
    cols = lax.broadcasted_iota(jnp.int32, shape, 1)
    x = (rows * shape[1] + cols).astype(jnp.uint32)
    x = x + seed_u32 * jnp.uint32(0x9E3779B9)
    x = x ^ (x >> 16)
    x = x * jnp.uint32(0x7FEB352D)
    x = x ^ (x >> 15)
    x = x * jnp.uint32(0x846CA68B)
    x = x ^ (x >> 16)
    return x


def _make_policy_net_kernel(in_size, hidden_size):
    """Kernel factory; in_size/hidden_size are static Python ints used for the
    static slices that split the packed weight+bias buffers."""

    def kernel(seed_ref, x_ref, w1b_ref, w2b_ref, o_ref):
        # ---- fc1: (B, IN) @ (IN, H) + (1, H); W1b = [W1^T ; b1] packed ----
        x = x_ref[...]
        w1 = w1b_ref[0:in_size, :]
        b1 = w1b_ref[in_size:in_size + 1, :]
        h = jnp.dot(x, w1, preferred_element_type=jnp.float32) + b1

        # ---- Dropout(p=0.8) + ReLU fused into one select ----
        # The 1/keep_prob rescale is pre-folded into W2 (w2b_ref) by prepare_params.
        seed = seed_ref[0].astype(jnp.uint32)
        bits = _uniform_u32(seed, h.shape)                 # explicit uint32 bits
        keep = bits < jnp.uint32(KEEP_THRESHOLD)
        h = jnp.where(keep & (h > 0.0), h, 0.0)

        # ---- fc2: (B, H) @ (H, O) + (1, O); W2b = [5*W2^T ; b2] packed ----
        w2 = w2b_ref[0:hidden_size, :]
        b2 = w2b_ref[hidden_size:hidden_size + 1, :]
        logits = jnp.dot(h, w2, preferred_element_type=jnp.float32) + b2

        # ---- Softmax over dim=0 (batch axis), faithful to the PyTorch code ----
        m = jnp.max(logits, axis=0, keepdims=True)
        e = jnp.exp(logits - m)
        s = jnp.sum(e, axis=0, keepdims=True)
        o_ref[...] = e / s                                  # exact divide (free here)

    return kernel


def prepare_params(w1, b1, w2, b2):
    """One-time layout prep, hoisted out of the per-step path.

    w1: (hidden, input), b1: (hidden,), w2: (output, hidden), b2: (output,)
    Returns two packed f32 buffers:
      w1b = [W1^T ; b1]        shape (input+1, hidden)
      w2b = [W2^T * 5 ; b2]    shape (hidden+1, output)  (dropout rescale folded in)
    """
    w1_t = jnp.asarray(w1, jnp.float32).T                            # (input, hidden)
    b1_r = jnp.asarray(b1, jnp.float32).reshape(1, -1)               # (1, hidden)
    w2_t = jnp.asarray(w2, jnp.float32).T * jnp.float32(INV_KEEP)    # (hidden, output)
    b2_r = jnp.asarray(b2, jnp.float32).reshape(1, -1)               # (1, output)
    w1b = jnp.concatenate([w1_t, b1_r], axis=0)
    w2b = jnp.concatenate([w2_t, b2_r], axis=0)
    return w1b, w2b


@jax.jit
def policy_net_forward(params, x, seed):
    """params: output of prepare_params; x: (B, input_size); seed: int32 scalar."""
    w1b, w2b = params
    B, IN = x.shape
    H = w1b.shape[1]
    O = w2b.shape[1]

    seed_arr = jnp.asarray(seed, jnp.int32).reshape(1)
    x_f32 = jnp.asarray(x, jnp.float32)

    vmem = pl.BlockSpec(memory_space=pltpu.MemorySpace.VMEM)
    smem = pl.BlockSpec(memory_space=pltpu.MemorySpace.SMEM)

    cost = pl.CostEstimate(
        flops=2 * B * (IN * H + H * O),
        transcendentals=B * O,                               # exp in softmax
        bytes_accessed=4 * (B * IN + (IN + 1) * H + (H + 1) * O + B * O),
    )

    return pl.pallas_call(
        _make_policy_net_kernel(IN, H),
        out_shape=jax.ShapeDtypeStruct((B, O), jnp.float32),
        in_specs=[smem, vmem, vmem, vmem],
        out_specs=vmem,
        cost_estimate=cost,
    )(seed_arr, x_f32, w1b, w2b)


def reference_forward(w1, b1, w2, b2, x, seed):
    """Pure-jnp reference with the identical hash-based dropout mask."""
    x = jnp.asarray(x, jnp.float32)
    h = x @ jnp.asarray(w1, jnp.float32).T + jnp.asarray(b1, jnp.float32)
    bits = _uniform_u32(jnp.uint32(seed), h.shape)
    keep = bits < jnp.uint32(KEEP_THRESHOLD)
    h = jnp.where(keep, h * jnp.float32(INV_KEEP), 0.0)      # dropout (train mode)
    h = jnp.maximum(h, 0.0)                                  # ReLU
    logits = h @ jnp.asarray(w2, jnp.float32).T + jnp.asarray(b2, jnp.float32)
    z = logits - jnp.max(logits, axis=0, keepdims=True)
    e = jnp.exp(z)
    return e / jnp.sum(e, axis=0, keepdims=True)


def init_linear_params(key, in_features, out_features):
    """Deterministic PyTorch-style nn.Linear init: U(-1/sqrt(in), 1/sqrt(in))."""
    kw, kb = jax.random.split(key)
    bound = 1.0 / jnp.sqrt(jnp.float32(in_features))
    w = jax.random.uniform(kw, (out_features, in_features), jnp.float32,
                           minval=-bound, maxval=bound)
    b = jax.random.uniform(kb, (out_features,), jnp.float32,
                           minval=-bound, maxval=bound)
    return w, b


if __name__ == "__main__":
    # Small shapes consistent with the module: Policy_net(16, 32, 4), batch=8.
    batch, input_size, hidden_size, output_size = 8, 16, 32, 4

    key = jax.random.PRNGKey(0)
    kx, k1, k2 = jax.random.split(key, 3)

    x = jax.random.normal(kx, (batch, input_size), jnp.float32)
    w1, b1 = init_linear_params(k1, input_size, hidden_size)
    w2, b2 = init_linear_params(k2, hidden_size, output_size)

    params = prepare_params(w1, b1, w2, b2)          # one-time layout prep
    seed = 1234                                      # advance per step in an RL loop
    out = jax.block_until_ready(policy_net_forward(params, x, seed))

    ref = reference_forward(w1, b1, w2, b2, x, seed)

    # Sanity: shape, finiteness, softmax over dim=0 => columns sum to 1, and the
    # kernel matches the pure-jnp reference (identical dropout mask by construction).
    col_sums = jnp.sum(out, axis=0)
    assert out.shape == (batch, output_size)
    assert bool(jnp.all(jnp.isfinite(out)))
    assert bool(jnp.all(out >= 0.0))
    assert bool(jnp.all(jnp.abs(col_sums - 1.0) < 1e-4))
    assert bool(jnp.allclose(out, ref, atol=2e-3, rtol=2e-3))

    print("KERNEL_OK")
</pallas_src>

<mosaic_0001>
module attributes {stable_mosaic.version = 11 : i64} {
  func.func @kernel(%arg0: memref<1xi32, #tpu.memory_space<smem>>, %arg1: memref<8x16xf32, #tpu.memory_space<vmem>>, %arg2: memref<17x32xf32, #tpu.memory_space<vmem>>, %arg3: memref<33x4xf32, #tpu.memory_space<vmem>>, %arg4: memref<8x4xf32, #tpu.memory_space<vmem>>) attributes {dimension_semantics = [], scalar_prefetch = 0 : i64, scratch_operands = 0 : i64, tpu.core_type = #tpu.core_type<tc>} {
    %c0 = arith.constant 0 : index
    %c0_0 = arith.constant 0 : index
    %0 = vector.load %arg1[%c0, %c0_0] : memref<8x16xf32, #tpu.memory_space<vmem>>, vector<8x16xf32>
    %c0_1 = arith.constant 0 : index
    %c0_2 = arith.constant 0 : index
    %1 = vector.load %arg2[%c0_1, %c0_2] : memref<17x32xf32, #tpu.memory_space<vmem>>, vector<16x32xf32>
    %c16 = arith.constant 16 : index
    %c0_3 = arith.constant 0 : index
    %2 = vector.load %arg2[%c16, %c0_3] : memref<17x32xf32, #tpu.memory_space<vmem>>, vector<1x32xf32>
    %cst = arith.constant dense<0.000000e+00> : vector<8x32xf32>
    %3 = tpu.matmul %0, %1, %cst {dimension_numbers = #tpu.dot_dimension_numbers<[1], [0], [0], [1], [0, 0, 1, 1], [], []>} : vector<8x16xf32>, vector<16x32xf32>, vector<8x32xf32> -> vector<8x32xf32>
    %4 = vector.broadcast %2 : vector<1x32xf32> to vector<8x32xf32>
    %5 = arith.addf %3, %4 : vector<8x32xf32>
    %c0_4 = arith.constant 0 : index
    %6 = memref.load %arg0[%c0_4] : memref<1xi32, #tpu.memory_space<smem>>
    %7 = tpu.iota {dimensions = array<i32: 0>} : vector<8x32xi32>
    %8 = tpu.iota {dimensions = array<i32: 1>} : vector<8x32xi32>
    %c32_i32 = arith.constant 32 : i32
    %9 = vector.broadcast %c32_i32 : i32 to vector<8x32xi32>
    %10 = arith.muli %7, %9 : vector<8x32xi32>
    %11 = arith.addi %10, %8 : vector<8x32xi32>
    %c-1640531527_i32 = arith.constant -1640531527 : i32
    %12 = arith.muli %6, %c-1640531527_i32 : i32
    %13 = vector.broadcast %12 : i32 to vector<8x32xi32>
    %14 = arith.addi %11, %13 : vector<8x32xi32>
    %c16_i32 = arith.constant 16 : i32
    %15 = vector.broadcast %c16_i32 : i32 to vector<8x32xi32>
    %16 = arith.shrui %14, %15 : vector<8x32xi32>
    %17 = arith.xori %14, %16 : vector<8x32xi32>
    %c2146121005_i32 = arith.constant 2146121005 : i32
    %18 = vector.broadcast %c2146121005_i32 : i32 to vector<8x32xi32>
    %19 = arith.muli %17, %18 : vector<8x32xi32>
    %c15_i32 = arith.constant 15 : i32
    %20 = vector.broadcast %c15_i32 : i32 to vector<8x32xi32>
    %21 = arith.shrui %19, %20 : vector<8x32xi32>
    %22 = arith.xori %19, %21 : vector<8x32xi32>
    %c-2073254261_i32 = arith.constant -2073254261 : i32
    %23 = vector.broadcast %c-2073254261_i32 : i32 to vector<8x32xi32>
    %24 = arith.muli %22, %23 : vector<8x32xi32>
    %c16_i32_5 = arith.constant 16 : i32
    %25 = vector.broadcast %c16_i32_5 : i32 to vector<8x32xi32>
    %26 = arith.shrui %24, %25 : vector<8x32xi32>
    %27 = arith.xori %24, %26 : vector<8x32xi32>
    %c858993459_i32 = arith.constant 858993459 : i32
    %28 = vector.broadcast %c858993459_i32 : i32 to vector<8x32xi32>
    %29 = arith.cmpi ult, %27, %28 : vector<8x32xi32>
    %cst_6 = arith.constant 0.000000e+00 : f32
    %30 = vector.broadcast %cst_6 : f32 to vector<8x32xf32>
    %31 = arith.cmpf ogt, %5, %30 : vector<8x32xf32>
    %32 = arith.andi %29, %31 : vector<8x32xi1>
    %cst_7 = arith.constant 0.000000e+00 : f32
    %33 = vector.broadcast %cst_7 : f32 to vector<8x32xf32>
    %34 = arith.select %32, %5, %33 : vector<8x32xi1>, vector<8x32xf32>
    %c0_8 = arith.constant 0 : index
    %c0_9 = arith.constant 0 : index
    %35 = vector.load %arg3[%c0_8, %c0_9] : memref<33x4xf32, #tpu.memory_space<vmem>>, vector<32x4xf32>
    %c32 = arith.constant 32 : index
    %c0_10 = arith.constant 0 : index
    %36 = vector.load %arg3[%c32, %c0_10] : memref<33x4xf32, #tpu.memory_space<vmem>>, vector<1x4xf32>
    %cst_11 = arith.constant dense<0.000000e+00> : vector<8x4xf32>
    %37 = tpu.matmul %34, %35, %cst_11 {dimension_numbers = #tpu.dot_dimension_numbers<[1], [0], [0], [1], [0, 0, 1, 1], [], []>} : vector<8x32xf32>, vector<32x4xf32>, vector<8x4xf32> -> vector<8x4xf32>
    %38 = vector.broadcast %36 : vector<1x4xf32> to vector<8x4xf32>
    %39 = arith.addf %37, %38 : vector<8x4xf32>
    %cst_12 = arith.constant dense<0xFF800000> : vector<4xf32>
    %40 = vector.multi_reduction <maximumf>, %39, %cst_12 [0] : vector<8x4xf32> to vector<4xf32>
    %41 = vector.shape_cast %40 : vector<4xf32> to vector<1x4xf32>
    %42 = vector.broadcast %41 : vector<1x4xf32> to vector<8x4xf32>
    %43 = arith.subf %39, %42 : vector<8x4xf32>
    %44 = math.exp %43 : vector<8x4xf32>
    %cst_13 = arith.constant dense<0.000000e+00> : vector<4xf32>
    %45 = vector.multi_reduction <add>, %44, %cst_13 [0] : vector<8x4xf32> to vector<4xf32>
    %46 = vector.shape_cast %45 : vector<4xf32> to vector<1x4xf32>
    %47 = vector.broadcast %46 : vector<1x4xf32> to vector<8x4xf32>
    %48 = arith.divf %44, %47 : vector<8x4xf32>
    %c0_14 = arith.constant 0 : index
    %c0_15 = arith.constant 0 : index
    %49 = vector.load %arg4[%c0_14, %c0_15] : memref<8x4xf32, #tpu.memory_space<vmem>>, vector<8x4xf32>
    tpu.vector_store %arg4[%c0_14, %c0_15], %48 {strides = array<i32>} : memref<8x4xf32, #tpu.memory_space<vmem>>, vector<8x4xf32>,
    return
  }
}

</mosaic_0001>

<bundles_post_ra>
// kernel: policy_net_forward.1
= control target key start
LH: loop header
LB: loop body
LE: loop exit
PB: predicated region body
PF: predicated region fallthrough
CT: control target
= control target key end

     0   :  { %v276_v0 = vmov 0.0|0.0   ;;  %vm277_vm0 = vmmov 0   ;;  %v278_v3 = vmov 0.0   ;;  %vm26_vm1 = vcmask 130048   ;;  %s340_s2 = inlined_call_operand.vmem [shape: f32[17,32], index: 2, kind: input, shape index: {}]   ;;  %s341_s3 = inlined_call_operand.vmem [shape: f32[33,4], index: 3, kind: input, shape index: {}]   ;;  %s342_s1 = inlined_call_operand.vmem [shape: f32[8,16], index: 1, kind: input, shape index: {}]   ;;  %s343_s0 = inlined_call_operand.<no memory space> [shape: s32[1], index: 0, kind: input, shape index: {}]   ;;  %s344_s4 = inlined_call_operand.vmem [shape: f32[8,4], index: 4, kind: output, shape index: {}]  }
   0x1   :  { %260 = vmatprep.subr.bf16.mxu0 %v276_v0  ;;  %v19_v1 = vld [vmem:[%s340_s2] sm:$0xff]  ;;  %v20_v2 = vld [vmem:[%s340_s2 + $0x8] sm:$0xff]  ;;  %246 = vmatprep.mubr.msk.f32.mxu0 %vm277_vm0, %v278_v3  ;;  %v124_v9 = vld [vmem:[%s341_s3 + $0x10] sm:$0xff]  ;;  %v101_v12 = vlaneseq  ;;  %s107_s30 = smul.u32 2654435769, %s343_s0  ;;  %vm131_vm4 = vcmask 261120  }
   0x2   :  { %v261_v4 = vpack.c.bf16 %v20_v2, %v19_v1  ;;  %263 = vmatprep.subr.bf16.mxu1 %v276_v0  ;;  %v122_v5 = vld [vmem:[%s341_s3] sm:$0xff]  ;;  %v123_v6 = vld [vmem:[%s341_s3 + $0x8] sm:$0xff]  ;;  %257 = vmatprep.mubr.msk.f32.mxu1 %vm277_vm0, %v278_v3  ;;  %v125_v10 = vld [vmem:[%s341_s3 + $0x18] sm:$0xff]  ;;  %vm205_vm6 = vcmask 31744  }
   0x3   :  { %v264_v7 = vpack.c.bf16 %v123_v6, %v122_v5  ;;  %v18_v8 = vld [vmem:[%s342_s1] sm:$0xff]  ;;  %v267_v11 = vpack.c.bf16 %v125_v10, %v124_v9  ;;  %v102_v13 = vshrl.u32 %v101_v12, 7  ;;  %v104_v14 = vand.u32 127, %v101_v12  ;;  %v230_v27 = vld [vmem:[%s340_s2 + $0x10] ss:$0 sm:$0xff] }
   0x4   :  { %262 = vmatpush3.bf16.msra.mxu0 %v261_v4  ;;  %v108_v17 = vstv %s107_s30  ;;  %v232_v32 = vld [vmem:[%s341_s3 + $0x20] ss:$0 sm:$0xff] }
   0x5   :  { %265 = vmatpush3.bf16.msra.mxu1 %v264_v7  ;;  %v105_v15 = vmul.u32 32, %v102_v13 }
   0x6   :  { %266 = vmatprep.subr.bf16.mxu1 %v276_v0 }
   0x7   :  { %247 = vmatmul.mubr.msk.f32.vlgmr.msra.gmra.mrb[0].mxu0 %vm26_vm1, %v18_v8  ;;  %v106_v16 = vadd.s32 %v105_v15, %v104_v14 }
   0x9   :  { %268 = vmatpush3.bf16.msra.mxu1 %v267_v11  ;;  %v109_v18 = vadd.s32 %v108_v17, %v106_v16 }
   0xb   :  { %v110_v19 = vshrl.u32 %v109_v18, 16 }
   0xd   :  { %v111_v20 = vxor.u32 %v110_v19, %v109_v18 }
   0xf   :  { %v112_v21 = vmul.u32 2146121005, %v111_v20 }
  0x11   :  { %v113_v22 = vshrl.u32 %v112_v21, 15 }
  0x13   :  { %v114_v23 = vxor.u32 %v113_v22, %v112_v21 }
  0x15   :  { %v115_v24 = vmul.u32 2221713035, %v114_v23 }
  0x17   :  { %v116_v25 = vshrl.u32 %v115_v24, 16 }
  0x19   :  { %v117_v26 = vxor.u32 %v116_v25, %v115_v24 }
  0x1b   :  { %vm118_vm2 = vcmp.lt.u32.totalorder %v117_v26, 858993459 }
  0xda   :  { %v96_v28 = vpop.f32.mrb[0].mxu0 }
  0xdb   :  { %v97_v29 = vadd.f32 %v230_v27, %v96_v28  ;;  %v248_v30 = vpop.f32.mrb[1].mxu0 }
  0xdd   :  { %vm119_vm3 = vcmp.gt.f32.partialorder %v97_v29, 0.0 }
  0xde   :  { %vm120_vm5 = vmand %vm118_vm2, %vm119_vm3 }
  0xdf   :  { %v121_v31 = vsel %vm120_vm5, %v97_v29, 0.0 }
  0xe0   :  { %258 = vmatmul.mubr.msk.f32.vlgmr.msra.gmra.mrb[0].mxu1 %vm131_vm4, %v121_v31 }
 0x1b3   :  { %v201_v33 = vpop.f32.mrb[0].mxu1 }
 0x1b4   :  { %v202_v34 = vadd.f32 %v232_v32, %v201_v33  ;;  %v259_v35 = vpop.f32.mrb[1].mxu1 }
 0x1b6   :  { %v206_v36 = vsel %vm205_vm6, %v202_v34, -inf }
 0x1b7   :  { %v207_v37 = vrot.slane %v206_v36, 4 }
 0x1b9   :  { %v208_v38 = vmax.f32 %v206_v36, %v207_v37 }
 0x1bb   :  { %v209_v39 = vrot.slane %v208_v38, 2 }
 0x1bd   :  { %v210_v40 = vmax.f32 %v208_v38, %v209_v39 }
 0x1bf   :  { %v211_v41 = vrot.slane %v210_v40, 1 }
 0x1c1   :  { %v212_v42 = vmax.f32 %v210_v40, %v211_v41 }
 0x1c3   :  { %v213_v43 = vsub.f32 %v202_v34, %v212_v42 }
 0x1c5   :  { %v214_v44 = vmul.f32 1.442695, %v213_v43 }
 0x1c7   :  { %272 = vpow2.f32 %v214_v44 }
 0x1d1   :  { %v273_v45 = vpop.eup %272 }
 0x1d2   :  { %v216_v46 = vsel %vm205_vm6, %v273_v45, 0.0 }
 0x1d3   :  { %v217_v47 = vrot.slane %v216_v46, 4 }
 0x1d5   :  { %v218_v48 = vadd.f32 %v217_v47, %v216_v46 }
 0x1d7   :  { %v219_v49 = vrot.slane %v218_v48, 2 }
 0x1d9   :  { %v220_v50 = vadd.f32 %v219_v49, %v218_v48 }
 0x1db   :  { %v221_v51 = vrot.slane %v220_v50, 1 }
 0x1dd   :  { %v222_v52 = vadd.f32 %v221_v51, %v220_v50 }
 0x1df   :  { %274 = vrcp.f32 %v222_v52 }
 0x1e9   :  { %v275_v53 = vpop.eup %274 }
 0x1ea   :  { %v224_v54 = vmul.f32 %v275_v53, %v273_v45 }
 0x1ec   :  { %225 = vst.msk [vmem:[%s344_s4] sm:$0xff] %vm205_vm6, %v224_v54 }

</bundles_post_ra>
